<compile_context>
chip_gen: v7x
topology: tpu7x:2x2x1
jax: 0.10.0
libtpu: 0.0.40
codegen_flags: <defaults>
</compile_context>

<pallas_src>
import jax
import jax.numpy as jnp
from jax.experimental import pallas as pl
from jax.experimental.pallas import tpu as pltpu

_MAX_TILE = 8192  # rows per grid step; per-step VMEM stays well under 1 MiB


def _value_net_kernel(s_ref, a_ref, w1s_ref, w1a_ref, b1_ref,
                      w2_ref, b2_ref, w3_ref, b3_ref, out_ref):
    """Fused 3-layer MLP on one (TB, ...) batch tile; concat fused as two dots."""
    h1 = (jnp.dot(s_ref[...], w1s_ref[...], preferred_element_type=jnp.float32)
          + jnp.dot(a_ref[...], w1a_ref[...], preferred_element_type=jnp.float32)
          + b1_ref[...])
    h1 = jnp.maximum(h1, 0.0)

    h2 = jnp.dot(h1, w2_ref[...], preferred_element_type=jnp.float32) + b2_ref[...]
    h2 = jnp.maximum(h2, 0.0)

    out_ref[...] = (jnp.dot(h2, w3_ref[...], preferred_element_type=jnp.float32)
                    + b3_ref[...])


def _round_up(x, m):
    return ((x + m - 1) // m) * m


def _choose_batch_tile(batch, max_tile=_MAX_TILE):
    """Pick (tile_rows, padded_batch) minimizing pad waste; prefer >=2 grid steps."""
    b8 = _round_up(batch, 8)
    if b8 <= 8:
        tb = 8
    elif b8 <= 2 * max_tile:
        # Two balanced tiles -> both v7x TensorCores busy, minimal extra padding.
        tb = min(_round_up(pl.cdiv(b8, 2), 8), max_tile)
    else:
        # Large batch: pick the power-of-two tile minimizing padded rows;
        # ties prefer the larger tile (fewer grid steps).
        best = None
        for cand in (512, 1024, 2048, 4096, 8192):
            if cand > max_tile:
                break
            padded = pl.cdiv(b8, cand) * cand
            key = (padded, -cand)
            if best is None or key < best[0]:
                best = (key, cand)
        tb = best[1]
    padded = pl.cdiv(b8, tb) * tb
    return tb, padded


def value_network_forward(state, action, params):
    """Critic forward pass.  state: [B, S], action: [B, A] -> q: [B, out]."""
    w1, b1, w2, b2, w3, b3 = params
    state = state.astype(jnp.float32)
    action = action.astype(jnp.float32)
    w1 = w1.astype(jnp.float32)
    b1 = b1.astype(jnp.float32)
    w2 = w2.astype(jnp.float32)
    b2 = b2.astype(jnp.float32)
    w3 = w3.astype(jnp.float32)
    b3 = b3.astype(jnp.float32)

    batch, state_dim = state.shape
    action_dim = action.shape[1]
    hidden = w1.shape[1]
    out_size = w3.shape[1]

    # Fuse the concat: split W1 by input rows once (tiny weight slices).
    w1_s = w1[:state_dim, :]
    w1_a = w1[state_dim:, :]

    # Adaptive batch tiling (minimal padding, >=2 steps when possible).
    tb, padded = _choose_batch_tile(batch)
    if padded != batch:
        pad_rows = padded - batch
        state = jnp.pad(state, ((0, pad_rows), (0, 0)))
        action = jnp.pad(action, ((0, pad_rows), (0, 0)))
    grid = (padded // tb,)

    def row_spec(feat):
        return pl.BlockSpec((tb, feat), lambda i: (i, 0))

    def const_spec(shape):
        # Constant block index -> weights/biases stay resident in VMEM.
        return pl.BlockSpec(shape, lambda i: (0, 0))

    out = pl.pallas_call(
        _value_net_kernel,
        out_shape=jax.ShapeDtypeStruct((padded, out_size), jnp.float32),
        grid=grid,
        in_specs=[
            row_spec(state_dim),                 # state tile
            row_spec(action_dim),                # action tile
            const_spec((state_dim, hidden)),     # W1[:state_dim]
            const_spec((action_dim, hidden)),    # W1[state_dim:]
            const_spec((1, hidden)),             # b1
            const_spec((hidden, hidden)),        # W2
            const_spec((1, hidden)),             # b2
            const_spec((hidden, out_size)),      # W3 (unpadded)
            const_spec((1, out_size)),           # b3 (unpadded)
        ],
        out_specs=pl.BlockSpec((tb, out_size), lambda i: (i, 0)),
        compiler_params=pltpu.CompilerParams(
            dimension_semantics=("parallel",),   # batch tiles across v7x's 2 TCs
        ),
    )(state, action, w1_s, w1_a, b1, w2, b2, w3, b3)

    if padded != batch:
        out = out[:batch]
    return out


def init_params(key, input_size, hidden_size, output_size):
    """Deterministic init mirroring nn.Linear default: U(-1/sqrt(fan_in), 1/sqrt(fan_in))."""
    def linear(key, fan_in, fan_out):
        kw, kb = jax.random.split(key)
        bound = 1.0 / jnp.sqrt(fan_in)
        w = jax.random.uniform(kw, (fan_in, fan_out), jnp.float32, -bound, bound)
        b = jax.random.uniform(kb, (1, fan_out), jnp.float32, -bound, bound)
        return w, b

    k1, k2, k3 = jax.random.split(key, 3)
    w1, b1 = linear(k1, input_size, hidden_size)
    w2, b2 = linear(k2, hidden_size, hidden_size)
    w3, b3 = linear(k3, hidden_size, output_size)
    return (w1, b1, w2, b2, w3, b3)


def value_network_ref(state, action, params):
    """Pure-JAX reference for correctness checking."""
    w1, b1, w2, b2, w3, b3 = params
    x = jnp.concatenate([state, action], axis=1)
    x = jnp.maximum(x @ w1 + b1, 0.0)
    x = jnp.maximum(x @ w2 + b2, 0.0)
    return x @ w3 + b3


if __name__ == "__main__":
    state_dim = 6
    action_dim = 2
    input_size = state_dim + action_dim   # concat([state, action], 1)
    hidden_size = 32
    output_size = 1

    key = jax.random.PRNGKey(0)
    k_state, k_action, k_params = jax.random.split(key, 3)
    params = init_params(k_params, input_size, hidden_size, output_size)

    # Small case (single tile, padded batch) and a multi-tile case that
    # exercises the 2-step parallel grid / minimal-pad path (600 -> 2x304).
    for batch in (2, 600):
        ks, ka = jax.random.split(jax.random.fold_in(k_state, batch))
        state = jax.random.normal(ks, (batch, state_dim), jnp.float32)
        action = jax.random.normal(ka, (batch, action_dim), jnp.float32)

        q = value_network_forward(state, action, params)
        q = jax.block_until_ready(q)

        q_ref = value_network_ref(state, action, params)
        assert q.shape == (batch, output_size), q.shape
        assert jnp.allclose(q, q_ref, atol=1e-5, rtol=1e-5)

    print("KERNEL_OK")
</pallas_src>

<mosaic_0001>
module attributes {stable_mosaic.version = 11 : i64} {
  func.func @_value_net_kernel(%arg0: i32, %arg1: memref<8x6xf32, #tpu.memory_space<vmem>>, %arg2: memref<8x2xf32, #tpu.memory_space<vmem>>, %arg3: memref<6x32xf32, #tpu.memory_space<vmem>>, %arg4: memref<2x32xf32, #tpu.memory_space<vmem>>, %arg5: memref<1x32xf32, #tpu.memory_space<vmem>>, %arg6: memref<32x32xf32, #tpu.memory_space<vmem>>, %arg7: memref<1x32xf32, #tpu.memory_space<vmem>>, %arg8: memref<32x1xf32, #tpu.memory_space<vmem>>, %arg9: memref<1x1xf32, #tpu.memory_space<vmem>>, %arg10: memref<8x1xf32, #tpu.memory_space<vmem>>) attributes {dimension_semantics = [#tpu.dimension_semantics<parallel>], iteration_bounds = array<i64: 1>, scalar_prefetch = 0 : i64, scratch_operands = 0 : i64, tpu.core_type = #tpu.core_type<tc>, window_params = [{transform_indices = @transform_0, window_bounds = array<i64: 8, 6>}, {transform_indices = @transform_1, window_bounds = array<i64: 8, 2>}, {pipeline_mode = #tpu.pipeline_mode<synchronous>, transform_indices = @transform_2, window_bounds = array<i64: 6, 32>}, {pipeline_mode = #tpu.pipeline_mode<synchronous>, transform_indices = @transform_3, window_bounds = array<i64: 2, 32>}, {pipeline_mode = #tpu.pipeline_mode<synchronous>, transform_indices = @transform_4, window_bounds = array<i64: 1, 32>}, {pipeline_mode = #tpu.pipeline_mode<synchronous>, transform_indices = @transform_5, window_bounds = array<i64: 32, 32>}, {pipeline_mode = #tpu.pipeline_mode<synchronous>, transform_indices = @transform_6, window_bounds = array<i64: 1, 32>}, {pipeline_mode = #tpu.pipeline_mode<synchronous>, transform_indices = @transform_7, window_bounds = array<i64: 32, 1>}, {pipeline_mode = #tpu.pipeline_mode<synchronous>, transform_indices = @transform_8, window_bounds = array<i64: 1, 1>}, {transform_indices = @transform_9, window_bounds = array<i64: 8, 1>}]} {
    %c0 = arith.constant 0 : index
    %c0_0 = arith.constant 0 : index
    %0 = vector.load %arg1[%c0, %c0_0] : memref<8x6xf32, #tpu.memory_space<vmem>>, vector<8x6xf32>
    %c0_1 = arith.constant 0 : index
    %c0_2 = arith.constant 0 : index
    %1 = vector.load %arg3[%c0_1, %c0_2] : memref<6x32xf32, #tpu.memory_space<vmem>>, vector<6x32xf32>
    %cst = arith.constant dense<0.000000e+00> : vector<8x32xf32>
    %2 = tpu.matmul %0, %1, %cst {dimension_numbers = #tpu.dot_dimension_numbers<[1], [0], [0], [1], [0, 0, 1, 1], [], []>} : vector<8x6xf32>, vector<6x32xf32>, vector<8x32xf32> -> vector<8x32xf32>
    %c0_3 = arith.constant 0 : index
    %c0_4 = arith.constant 0 : index
    %3 = vector.load %arg2[%c0_3, %c0_4] : memref<8x2xf32, #tpu.memory_space<vmem>>, vector<8x2xf32>
    %c0_5 = arith.constant 0 : index
    %c0_6 = arith.constant 0 : index
    %4 = vector.load %arg4[%c0_5, %c0_6] : memref<2x32xf32, #tpu.memory_space<vmem>>, vector<2x32xf32>
    %cst_7 = arith.constant dense<0.000000e+00> : vector<8x32xf32>
    %5 = tpu.matmul %3, %4, %cst_7 {dimension_numbers = #tpu.dot_dimension_numbers<[1], [0], [0], [1], [0, 0, 1, 1], [], []>} : vector<8x2xf32>, vector<2x32xf32>, vector<8x32xf32> -> vector<8x32xf32>
    %6 = arith.addf %2, %5 : vector<8x32xf32>
    %c0_8 = arith.constant 0 : index
    %c0_9 = arith.constant 0 : index
    %7 = vector.load %arg5[%c0_8, %c0_9] : memref<1x32xf32, #tpu.memory_space<vmem>>, vector<1x32xf32>
    %8 = vector.broadcast %7 : vector<1x32xf32> to vector<8x32xf32>
    %9 = arith.addf %6, %8 : vector<8x32xf32>
    %cst_10 = arith.constant 0.000000e+00 : f32
    %10 = vector.broadcast %cst_10 : f32 to vector<8x32xf32>
    %11 = arith.maximumf %9, %10 : vector<8x32xf32>
    %c0_11 = arith.constant 0 : index
    %c0_12 = arith.constant 0 : index
    %12 = vector.load %arg6[%c0_11, %c0_12] : memref<32x32xf32, #tpu.memory_space<vmem>>, vector<32x32xf32>
    %cst_13 = arith.constant dense<0.000000e+00> : vector<8x32xf32>
    %13 = tpu.matmul %11, %12, %cst_13 {dimension_numbers = #tpu.dot_dimension_numbers<[1], [0], [0], [1], [0, 0, 1, 1], [], []>} : vector<8x32xf32>, vector<32x32xf32>, vector<8x32xf32> -> vector<8x32xf32>
    %c0_14 = arith.constant 0 : index
    %c0_15 = arith.constant 0 : index
    %14 = vector.load %arg7[%c0_14, %c0_15] : memref<1x32xf32, #tpu.memory_space<vmem>>, vector<1x32xf32>
    %15 = vector.broadcast %14 : vector<1x32xf32> to vector<8x32xf32>
    %16 = arith.addf %13, %15 : vector<8x32xf32>
    %cst_16 = arith.constant 0.000000e+00 : f32
    %17 = vector.broadcast %cst_16 : f32 to vector<8x32xf32>
    %18 = arith.maximumf %16, %17 : vector<8x32xf32>
    %c0_17 = arith.constant 0 : index
    %c0_18 = arith.constant 0 : index
    %19 = vector.load %arg8[%c0_17, %c0_18] : memref<32x1xf32, #tpu.memory_space<vmem>>, vector<32x1xf32>
    %cst_19 = arith.constant dense<0.000000e+00> : vector<8x1xf32>
    %20 = tpu.matmul %18, %19, %cst_19 {dimension_numbers = #tpu.dot_dimension_numbers<[1], [0], [0], [1], [0, 0, 1, 1], [], []>} : vector<8x32xf32>, vector<32x1xf32>, vector<8x1xf32> -> vector<8x1xf32>
    %c0_20 = arith.constant 0 : index
    %c0_21 = arith.constant 0 : index
    %21 = vector.load %arg9[%c0_20, %c0_21] : memref<1x1xf32, #tpu.memory_space<vmem>>, vector<1x1xf32>
    %22 = vector.broadcast %21 : vector<1x1xf32> to vector<8x1xf32>
    %23 = arith.addf %20, %22 : vector<8x1xf32>
    %c0_22 = arith.constant 0 : index
    %c0_23 = arith.constant 0 : index
    %24 = vector.load %arg10[%c0_22, %c0_23] : memref<8x1xf32, #tpu.memory_space<vmem>>, vector<8x1xf32>
    tpu.vector_store %arg10[%c0_22, %c0_23], %23 {strides = array<i32>} : memref<8x1xf32, #tpu.memory_space<vmem>>, vector<8x1xf32>,
    return
  }
  func.func @transform_0(%arg0: i32) -> (i32, i32) {
    %c0_i32 = arith.constant 0 : i32
    %c0_i32_0 = arith.constant 0 : i32
    return %arg0, %c0_i32 : i32, i32
  }
  func.func @transform_1(%arg0: i32) -> (i32, i32) {
    %c0_i32 = arith.constant 0 : i32
    %c0_i32_0 = arith.constant 0 : i32
    return %arg0, %c0_i32 : i32, i32
  }
  func.func @transform_2(%arg0: i32) -> (i32, i32) {
    %c0_i32 = arith.constant 0 : i32
    %c0_i32_0 = arith.constant 0 : i32
    %c0_i32_1 = arith.constant 0 : i32
    return %c0_i32, %c0_i32_0 : i32, i32
  }
  func.func @transform_3(%arg0: i32) -> (i32, i32) {
    %c0_i32 = arith.constant 0 : i32
    %c0_i32_0 = arith.constant 0 : i32
    %c0_i32_1 = arith.constant 0 : i32
    return %c0_i32, %c0_i32_0 : i32, i32
  }
  func.func @transform_4(%arg0: i32) -> (i32, i32) {
    %c0_i32 = arith.constant 0 : i32
    %c0_i32_0 = arith.constant 0 : i32
    %c0_i32_1 = arith.constant 0 : i32
    return %c0_i32, %c0_i32_0 : i32, i32
  }
  func.func @transform_5(%arg0: i32) -> (i32, i32) {
    %c0_i32 = arith.constant 0 : i32
    %c0_i32_0 = arith.constant 0 : i32
    %c0_i32_1 = arith.constant 0 : i32
    return %c0_i32, %c0_i32_0 : i32, i32
  }
  func.func @transform_6(%arg0: i32) -> (i32, i32) {
    %c0_i32 = arith.constant 0 : i32
    %c0_i32_0 = arith.constant 0 : i32
    %c0_i32_1 = arith.constant 0 : i32
    return %c0_i32, %c0_i32_0 : i32, i32
  }
  func.func @transform_7(%arg0: i32) -> (i32, i32) {
    %c0_i32 = arith.constant 0 : i32
    %c0_i32_0 = arith.constant 0 : i32
    %c0_i32_1 = arith.constant 0 : i32
    return %c0_i32, %c0_i32_0 : i32, i32
  }
  func.func @transform_8(%arg0: i32) -> (i32, i32) {
    %c0_i32 = arith.constant 0 : i32
    %c0_i32_0 = arith.constant 0 : i32
    %c0_i32_1 = arith.constant 0 : i32
    return %c0_i32, %c0_i32_0 : i32, i32
  }
  func.func @transform_9(%arg0: i32) -> (i32, i32) {
    %c0_i32 = arith.constant 0 : i32
    %c0_i32_0 = arith.constant 0 : i32
    return %arg0, %c0_i32 : i32, i32
  }
}

</mosaic_0001>

<bundles_post_ra>
// kernel: tpu_custom_call.1
= control target key start
LH: loop header
LB: loop body
LE: loop exit
PB: predicated region body
PF: predicated region fallthrough
CT: control target
= control target key end

     0   :  { %vm42_vm0 = vcmask 1041408   ;;  %vm120_vm1 = vcmask 1045504   ;;  %v449_v0 = vmov 0.0   ;;  %vm38_vm2 = vcmask 15360   ;;  %s552_s3 = inlined_call_operand.vmem [shape: f32[2,32], index: 3, kind: input, shape index: {}]   ;;  %s553_s2 = inlined_call_operand.vmem [shape: f32[6,32], index: 2, kind: input, shape index: {}]   ;;  %s554_s1 = inlined_call_operand.vmem [shape: f32[8,2], index: 1, kind: input, shape index: {}]   ;;  %s555_s0 = inlined_call_operand.vmem [shape: f32[8,6], index: 0, kind: input, shape index: {}]   ;;  %s556_s5 = inlined_call_operand.vmem [shape: f32[32,32], index: 5, kind: input, shape index: {}]   ;;  %s557_s7 = inlined_call_operand.vmem [shape: f32[32,1], index: 7, kind: input, shape index: {}]   ;;  %s558_s4 = inlined_call_operand.vmem [shape: f32[1,32], index: 4, kind: input, shape index: {}]   ;;  %s559_s8 = inlined_call_operand.<no memory space> [shape: f32[1,1], index: 8, kind: input, shape index: {}]   ;;  %s560_s6 = inlined_call_operand.vmem [shape: f32[1,32], index: 6, kind: input, shape index: {}]   ;;  %s561_s9 = inlined_call_operand.vmem [shape: f32[8,1], index: 9, kind: output, shape index: {}]  }
   0x1   :  { %402 = vmatprep.subr.mxu0 %v449_v0  ;;  %407 = vmatprep.subr.mxu1 %v449_v0  ;;  %v37_v1 = vld [vmem:[%s552_s3] sm:$0x3]  ;;  %vm450_vm3 = vmmov 0   ;;  %vm116_vm4 = vcmask 48128   ;;  %v451_v5 = vmov 0.0|0.0   ;;  %v204_v7 = vld [vmem:[%s556_s5 + $0x8] sm:$0xff]  ;;  %v14_v26 = vstv %s559_s8 }
   0x2   :  { %v35_v2 = vld [vmem:[%s553_s2] sm:$0x3f]  ;;  %403 = vmatpush3.msk.msra.mxu0 %vm42_vm0, %v37_v1  ;;  %404 = vmatprep.mubr.msk.f32.mxu0 %vm450_vm3, %v449_v0  ;;  %v205_v9 = vld [vmem:[%s556_s5 + $0x10] sm:$0xff]  ;;  %v206_v10 = vld [vmem:[%s556_s5 + $0x18] sm:$0xff]  ;;  %vm214_vm5 = vcmask 261120   ;;  %vm373_vm6 = vcmask 7168  }
   0x3   :  { %v36_v3 = vld [vmem:[%s554_s1] sm:$0xff]  ;;  %408 = vmatpush3.msk.msra.mxu1 %vm120_vm1, %v35_v2  ;;  %409 = vmatprep.mubr.msk.f32.mxu1 %vm450_vm3, %v449_v0  ;;  %v438_v11 = vpack.c.bf16 %v206_v10, %v205_v9  ;;  %v290_v13 = vld [vmem:[%s557_s7 + $0x8] sm:$0xff]  ;;  %v291_v23 = vld [vmem:[%s557_s7 + $0x10] sm:$0xff]  ;;  %15 = vst [vmem:[#allocation2] sm:$0x1] %v14_v26 }
   0x4   :  { %v34_v4 = vld [vmem:[%s555_s0] sm:$0xff]  ;;  %405 = vmatmul.mubr.msk.f32.vlgmr.msra.gmra.mrb[0].mxu0 %vm38_vm2, %v36_v3  ;;  %434 = vmatprep.subr.bf16.mxu0 %v451_v5  ;;  %v292_v24 = vld [vmem:[%s557_s7 + $0x18] sm:$0xff] }
   0x5   :  { %410 = vmatmul.mubr.msk.f32.vlgmr.msra.gmra.mrb[0].mxu1 %vm116_vm4, %v34_v4  ;;  %420 = vmatprep.mubr.msk.f32.mxu0 %vm450_vm3, %v449_v0  ;;  %v203_v6 = vld [vmem:[%s556_s5] sm:$0xff]  ;;  %v444_v25 = vpack.c.bf16 %v292_v24, %v291_v23 }
   0x6   :  { %440 = vmatprep.subr.bf16.mxu1 %v451_v5  ;;  %431 = vmatprep.mubr.msk.f32.mxu1 %vm450_vm3, %v449_v0  ;;  %v435_v8 = vpack.c.bf16 %v204_v7, %v203_v6  ;;  %v289_v12 = vld [vmem:[%s557_s7] sm:$0xff] }
   0x7   :  { %v441_v14 = vpack.c.bf16 %v290_v13, %v289_v12  ;;  %v383_v17 = vld [vmem:[%s558_s4] ss:$0 sm:$0xff] }
   0x8   :  { %436 = vmatpush3.bf16.msra.mxu0 %v435_v8  ;;  %v384_v27 = vld [vmem:[%s560_s6] ss:$0 sm:$0xff] }
   0x9   :  { %437 = vmatprep.subr.bf16.mxu0 %v451_v5  ;;  %442 = vmatpush3.bf16.msra.mxu1 %v441_v14 }
   0xa   :  { %443 = vmatprep.subr.bf16.mxu1 %v451_v5  ;;  %v386_v32 = vld [vmem:[#allocation2] ss:$0 sm:$0xff] }
   0xc   :  { %439 = vmatpush3.bf16.msra.mxu0 %v438_v11 }
   0xd   :  { %445 = vmatpush3.bf16.msra.mxu1 %v444_v25 }
  0xd7   :  { %v112_v15 = vpop.f32.mrb[0].mxu0 }
  0xd8   :  { %v190_v16 = vpop.f32.mrb[0].mxu1  ;;  %v406_v19 = vpop.f32.mrb[1].mxu0 }
  0xd9   :  { %v191_v18 = vadd.f32 %v190_v16, %v112_v15  ;;  %v411_v20 = vpop.f32.mrb[1].mxu1 }
  0xdb   :  { %v201_v21 = vadd.f32 %v383_v17, %v191_v18 }
  0xdd   :  { %v202_v22 = vmax.f32 %v201_v21, 0.0 }
  0xdf   :  { %421 = vmatmul.mubr.msk.f32.vlgmr.msra.gmra.mrb[2].mxu0 %vm214_vm5, %v202_v22 }
 0x1b2   :  { %v284_v28 = vpop.f32.mrb[2].mxu0 }
 0x1b3   :  { %v285_v29 = vadd.f32 %v384_v27, %v284_v28  ;;  %v422_v30 = vpop.f32.mrb[3].mxu0 }
 0x1b5   :  { %v288_v31 = vmax.f32 %v285_v29, 0.0 }
 0x1b7   :  { %432 = vmatmul.mubr.msk.f32.vlgmr.msra.gmra.mrb[2].mxu1 %vm214_vm5, %v288_v31 }
 0x28a   :  { %v369_v33 = vpop.f32.mrb[2].mxu1 }
 0x28b   :  { %v370_v34 = vadd.f32 %v386_v32, %v369_v33  ;;  %v433_v35 = vpop.f32.mrb[3].mxu1 }
 0x28d   :  { %374 = vst.msk [vmem:[%s561_s9] sm:$0xff] %vm373_vm6, %v370_v34 }

</bundles_post_ra>
